<compile_context>
chip_gen: v5e
topology: v5e:2x2
jax: 0.10.0
libtpu: 0.0.40
codegen_flags: <defaults>
</compile_context>

<pallas_src>
from functools import partial

import jax
import jax.numpy as jnp
from jax import lax
from jax.experimental import pallas as pl
from jax.experimental.pallas import tpu as pltpu

_F32 = jnp.float32


def _erf(z):
    # Abramowitz & Stegun 7.1.26 (|err| < 1.5e-7), exact division.
    a1, a2, a3, a4, a5 = (0.254829592, -0.284496736, 1.421413741,
                          -1.453152027, 1.061405429)
    p = 0.3275911
    za = jnp.abs(z)
    t = 1.0 / (1.0 + p * za)
    poly = ((((a5 * t + a4) * t + a3) * t + a2) * t + a1) * t
    y = 1.0 - poly * jnp.exp(-za * za)
    return jnp.where(z >= 0.0, y, -y)


# ---------------------------------------------------------------------------
# Pass 1: lane-dense x_c = Linear(GELU(LN(x))) + per-lane softmax / bn1 stats.
# ---------------------------------------------------------------------------
def _stats_kernel(D, x_ref, lng_ref, lnb_ref, w_ref, lb_ref, seg_ref,
                  xc_ref, chan_ref, bn_ref):
    WD = x_ref.shape[2]
    i = pl.program_id(1)

    @pl.when(i == 0)
    def _():
        chan_ref[0] = jnp.concatenate(
            [jnp.full((1, WD), -jnp.inf, _F32),     # running per-lane max
             jnp.zeros((1, WD), _F32)], axis=0)     # running per-lane denom
        bn_ref[0] = jnp.zeros((2, WD), _F32)        # per-lane [sum; sumsq]

    x = x_ref[0].astype(_F32)                       # (th, WD), lane-dense

    # bn1 batch statistics: per-lane (per (w, d)) partial sum / sum-of-squares;
    # reduced across (B, w) once in the wrapper.
    s = jnp.sum(x, axis=0, keepdims=True)
    sq = jnp.sum(x * x, axis=0, keepdims=True)
    bn_ref[0] = bn_ref[0] + jnp.concatenate([s, sq], axis=0)

    # LayerNorm over channels (eps=1e-6): per-pixel stats via block-diagonal
    # segment-sum matmuls (full-K MXU work, no relayout of the big tensor).
    inv_d = 1.0 / float(D)
    seg = seg_ref[...]
    mu = jnp.dot(x, seg, preferred_element_type=_F32) * inv_d
    msq = jnp.dot(x * x, seg, preferred_element_type=_F32) * inv_d
    xn = (x - mu) * lax.rsqrt(msq - mu * mu + 1e-6)
    xn = xn * lng_ref[...] + lnb_ref[...]

    # Exact (erf) GELU.
    g = 0.5 * xn * (1.0 + _erf(xn * 0.7071067811865476))

    # Linear(D, D) as one (th, WD) x (WD, WD) block-diagonal-weight matmul.
    xc = jnp.dot(g.astype(w_ref.dtype), w_ref[...],
                 preferred_element_type=_F32) + lb_ref[...]
    xc_ref[0] = xc.astype(xc_ref.dtype)

    # Per-lane online softmax over rows (combined across the W lane groups in
    # the wrapper).
    chan = chan_ref[0]
    m_prev = chan[0:1, :]
    l_prev = chan[1:2, :]
    m_new = jnp.maximum(m_prev, jnp.max(xc, axis=0, keepdims=True))
    p = jnp.exp(xc - m_new)
    l_new = l_prev * jnp.exp(m_prev - m_new) + jnp.sum(p, axis=0, keepdims=True)
    chan_ref[0] = jnp.concatenate([m_new, l_new], axis=0)


# ---------------------------------------------------------------------------
# Pass 2: bn1+relu, depthwise 3x3 conv, both softmaxes, y = x*attn, y stats.
# ---------------------------------------------------------------------------
def _attn_apply_kernel(D, K, x_ref, xc_ref, chan_ref, bn_ref, cw_ref, cb_ref,
                       seg_ref, smask_ref, hmask_ref, y_ref, psum_ref):
    H = x_ref.shape[1]
    WD = x_ref.shape[2]

    x = x_ref[0].astype(_F32)                       # (H, WD)
    bn = bn_ref[...]                                # (2, WD): [scale; shift]
    act = jnp.maximum(x * bn[0:1, :] + bn[1:2, :], 0.0)   # relu(bn1(x))

    # Depthwise 3x3 conv, padding=1.  W neighbours = lane rolls by +-D (wrapped
    # edge taps zeroed in the pre-tiled weights); H neighbours = sublane rolls
    # with the wrapped rows killed by (H, 1) border masks (no plane copies).
    hmask = hmask_ref[...]                          # (H, 2)
    up = pltpu.roll(act, 1, axis=0) * hmask[:, 0:1]       # row h-1
    dn = pltpu.roll(act, H - 1, axis=0) * hmask[:, 1:2]   # row h+1
    rows = (up, act, dn)
    cw = cw_ref[...]                                # (3, 3, WD)
    acc = None
    for i in range(3):
        for j in range(3):
            tap = rows[i] if j == 1 else pltpu.roll(
                rows[i], ((1 - j) * D) % WD, axis=1)
            term = cw[i, j] * tap
            acc = term if acc is None else acc + term     # first tap inits acc
    conv = acc + cb_ref[...]

    # Channel softmax per pixel, stabilised by the EXACT per-pixel max:
    # lane-local suffix-max butterfly (segment-start lane ends up holding the
    # full segment max), then broadcast with one block-diagonal matmul.
    seg = seg_ref[...]
    m = conv
    for k in range(K):
        s = 1 << k
        cand = pltpu.roll(m, (WD - s) % WD, axis=1)       # cand[p] = m[p + s]
        m = jnp.maximum(m, cand + smask_ref[k:k + 1, :])  # bias -1e30 if invalid
    pixmax = jnp.dot(m * smask_ref[K:K + 1, :], seg,
                     preferred_element_type=_F32)
    e = jnp.exp(conv - pixmax)
    denom = jnp.dot(e, seg, preferred_element_type=_F32)  # >= 1 (max lane)
    attn_s = e / denom                                     # exact division

    # Softmax over L (per-channel max and inverse denominator precomputed).
    chan = chan_ref[0]                              # (2, WD): [max; 1/denom]
    attn_c = jnp.exp(xc_ref[0].astype(_F32) - chan[0:1, :]) * chan[1:2, :]

    y = x * attn_c * attn_s
    y_cast = y.astype(y_ref.dtype)
    y_ref[0] = y_cast

    # Per-lane (sum, sumsq) of the *stored* y for the final BatchNorm.
    yf = y_cast.astype(_F32)
    psum_ref[0] = jnp.concatenate([jnp.sum(yf, axis=0, keepdims=True),
                                   jnp.sum(yf * yf, axis=0, keepdims=True)],
                                  axis=0)


# ---------------------------------------------------------------------------
# Pass 3: residual + final BatchNorm affine (hoisted to the wrapper).
# ---------------------------------------------------------------------------
def _residual_kernel(x_ref, y_ref, aff_ref, o_ref):
    aff = aff_ref[...]                              # (2, WD): [scale; shift]
    o_ref[0] = (x_ref[0].astype(_F32)
                + y_ref[0].astype(_F32) * aff[0:1, :]
                + aff[1:2, :]).astype(o_ref.dtype)


# ---------------------------------------------------------------------------
# Wrapper.
# ---------------------------------------------------------------------------
def _pick_rows(H, WD):
    """Largest H-tile <= ~8 MiB f32 that is a divisor of H (and 8-aligned)."""
    target = max(8, min(512, (8 * 1024 * 1024) // max(1, WD * 4)))
    if H <= target:
        return H
    for t in range(int(target), 7, -1):
        if H % t == 0 and t % 8 == 0:
            return t
    return H


def _vmem_limit_bytes():
    # Generation-dependent: ~96 MiB on v5e/v6e (128 MiB VMEM), ~48 MiB on v7x.
    try:
        cap = pltpu.get_tpu_info().vmem_capacity_bytes
    except Exception:
        cap = 64 * 1024 * 1024
    return int(cap * 3 // 4)


def _lanes(v, W):
    """Tile a per-channel (..., D) vector onto the lane axis p = w*D + d."""
    D = v.shape[-1]
    return jnp.broadcast_to(v[..., None, :], v.shape[:-1] + (W, D)
                            ).reshape(v.shape[:-1] + (W * D,))


def feature_enhance(x, H, W, params):
    """x: (B, L, D) with L == H*W.  Returns (B, L, D)."""
    B, L, D = x.shape
    assert L == H * W
    WD = W * D
    f32 = jnp.float32
    ln_g, ln_b, w_t, lb, bn1_g, bn1_b, cw, cb, nm_g, nm_b = params

    th = _pick_rows(H, WD)
    nH = H // th
    K = (D - 1).bit_length()            # ceil(log2(D)); 0 for D == 1
    vmem_limit = _vmem_limit_bytes()
    n_px = float(B * H * W)

    # ----- static lane-layout constants ------------------------------------
    pix = jnp.arange(WD) // D
    seg = (pix[:, None] == pix[None, :]).astype(f32)        # block-diag ones

    lng_wd = _lanes(ln_g.reshape(1, D), W)                  # (1, WD)
    lnb_wd = _lanes(ln_b.reshape(1, D), W)
    lb_wd = _lanes(lb.reshape(1, D), W)
    # Block-diagonal Linear weight: Wbd[w*D+d, w*D+d'] = w_t[d, d'].
    eye_w = jnp.eye(W, dtype=f32)
    wbd = (eye_w[:, None, :, None] * w_t.astype(f32)[None, :, None, :]
           ).reshape(WD, WD).astype(x.dtype)   # bf16 path engages for bf16 x

    # Depthwise conv weights tiled along lanes; wrapped W-edge taps zeroed so
    # lane rolls reproduce Conv2d's zero padding in W.
    cw_wd = jnp.broadcast_to(cw.astype(f32)[:, :, None, :], (3, 3, W, D))
    edge = jnp.ones((3, 3, W, D), f32)
    edge = edge.at[:, 0, 0, :].set(0.0)        # j=0 tap invalid at w=0
    edge = edge.at[:, 2, W - 1, :].set(0.0)    # j=2 tap invalid at w=W-1
    cw_wd = (cw_wd * edge).reshape(3, 3, WD)
    cb_wd = _lanes(cb.reshape(1, D), W)

    # Butterfly masks for the per-pixel (segment) max: rows 0..K-1 additive
    # neighbour-valid bias (0 / -1e30), row K multiplicative segment-start
    # selector.
    lane_mod = jnp.arange(WD) % D
    smask_rows = [jnp.where(lane_mod < D - (1 << k), 0.0, -1e30).astype(f32)
                  for k in range(K)]
    smask_rows.append((lane_mod == 0).astype(f32))
    smask = jnp.stack(smask_rows, axis=0)                   # (K+1, WD)

    # H-border masks for the sublane rolls (kill the wrapped rows).
    hidx = jnp.arange(H)
    hmask = jnp.stack([(hidx > 0).astype(f32),
                       (hidx < H - 1).astype(f32)], axis=1)  # (H, 2)

    x_img = x.reshape(B, H, WD)   # free: same row-major buffer as (B, L, D)

    # ---------------- pass 1: x_c + per-lane softmax / bn1 stats ------------
    xc_img, chan_lane, bn_lane = pl.pallas_call(
        partial(_stats_kernel, D),
        out_shape=(jax.ShapeDtypeStruct((B, H, WD), x.dtype),
                   jax.ShapeDtypeStruct((B, 2, WD), f32),
                   jax.ShapeDtypeStruct((B, 2, WD), f32)),
        grid=(B, nH),
        in_specs=[
            pl.BlockSpec((1, th, WD), lambda b, i: (b, i, 0)),
            pl.BlockSpec((1, WD), lambda b, i: (0, 0)),
            pl.BlockSpec((1, WD), lambda b, i: (0, 0)),
            pl.BlockSpec((WD, WD), lambda b, i: (0, 0)),
            pl.BlockSpec((1, WD), lambda b, i: (0, 0)),
            pl.BlockSpec((WD, WD), lambda b, i: (0, 0)),
        ],
        out_specs=(pl.BlockSpec((1, th, WD), lambda b, i: (b, i, 0)),
                   pl.BlockSpec((1, 2, WD), lambda b, i: (b, 0, 0)),
                   pl.BlockSpec((1, 2, WD), lambda b, i: (b, 0, 0))),
        compiler_params=pltpu.CompilerParams(
            dimension_semantics=("parallel", "arbitrary"),
            vmem_limit_bytes=vmem_limit),
    )(x_img, lng_wd, lnb_wd, wbd, lb_wd, seg)

    # ----- tiny wrapper finalisation (XLA), done once, not per grid step ----
    chan4 = chan_lane.reshape(B, 2, W, D)
    m_lane, l_lane = chan4[:, 0], chan4[:, 1]               # (B, W, D)
    m_bd = jnp.max(m_lane, axis=1)                          # (B, D)
    l_bd = jnp.sum(l_lane * jnp.exp(m_lane - m_bd[:, None, :]), axis=1)
    chan_wd = jnp.stack([_lanes(m_bd, W), _lanes(1.0 / l_bd, W)],
                        axis=1)                             # (B, 2, WD)

    bn4 = bn_lane.reshape(B, 2, W, D)
    bmean = jnp.sum(bn4[:, 0], axis=(0, 1)) / n_px
    bvar = jnp.sum(bn4[:, 1], axis=(0, 1)) / n_px - bmean * bmean
    bscale = bn1_g.reshape(D) * lax.rsqrt(bvar + 1e-5)
    bshift = bn1_b.reshape(D) - bmean * bscale
    bn_wd = jnp.stack([_lanes(bscale, W), _lanes(bshift, W)], axis=0)  # (2, WD)

    # -------------------- pass 2: attentions, y, y-stats --------------------
    y_img, psums = pl.pallas_call(
        partial(_attn_apply_kernel, D, K),
        out_shape=(jax.ShapeDtypeStruct((B, H, WD), x.dtype),
                   jax.ShapeDtypeStruct((B, 2, WD), f32)),
        grid=(B,),
        in_specs=[
            pl.BlockSpec((1, H, WD), lambda b: (b, 0, 0)),   # x (lane-dense)
            pl.BlockSpec((1, H, WD), lambda b: (b, 0, 0)),   # x_c
            pl.BlockSpec((1, 2, WD), lambda b: (b, 0, 0)),   # softmax(L) stats
            pl.BlockSpec((2, WD), lambda b: (0, 0)),         # bn1 scale/shift
            pl.BlockSpec((3, 3, WD), lambda b: (0, 0, 0)),   # conv w (tiled)
            pl.BlockSpec((1, WD), lambda b: (0, 0)),         # conv b (tiled)
            pl.BlockSpec((WD, WD), lambda b: (0, 0)),        # segment ones
            pl.BlockSpec((K + 1, WD), lambda b: (0, 0)),     # butterfly masks
            pl.BlockSpec((H, 2), lambda b: (0, 0)),          # H border masks
        ],
        out_specs=(pl.BlockSpec((1, H, WD), lambda b: (b, 0, 0)),
                   pl.BlockSpec((1, 2, WD), lambda b: (b, 0, 0))),
        compiler_params=pltpu.CompilerParams(
            dimension_semantics=("parallel",),
            vmem_limit_bytes=vmem_limit),
    )(x_img, xc_img, chan_wd, bn_wd, cw_wd, cb_wd, seg, smask, hmask)

    # ----- final BatchNorm affine from the y statistics (tiny XLA) ----------
    p4 = psums.reshape(B, 2, W, D)
    ymean = jnp.sum(p4[:, 0], axis=(0, 1)) / n_px
    yvar = jnp.sum(p4[:, 1], axis=(0, 1)) / n_px - ymean * ymean
    yscale = nm_g.reshape(D) * lax.rsqrt(yvar + 1e-5)
    yshift = nm_b.reshape(D) - ymean * yscale
    aff = jnp.stack([_lanes(yscale, W), _lanes(yshift, W)], axis=0)  # (2, WD)

    # -------------------- pass 3: residual + final BN -----------------------
    out_img = pl.pallas_call(
        _residual_kernel,
        out_shape=jax.ShapeDtypeStruct((B, H, WD), x.dtype),
        grid=(B,),
        in_specs=[
            pl.BlockSpec((1, H, WD), lambda b: (b, 0, 0)),
            pl.BlockSpec((1, H, WD), lambda b: (b, 0, 0)),
            pl.BlockSpec((2, WD), lambda b: (0, 0)),
        ],
        out_specs=pl.BlockSpec((1, H, WD), lambda b: (b, 0, 0)),
        compiler_params=pltpu.CompilerParams(
            dimension_semantics=("parallel",),
            vmem_limit_bytes=vmem_limit),
    )(x_img, y_img, aff)

    return out_img.reshape(B, L, D)


if __name__ == "__main__":
    B, D, H, W = 2, 16, 16, 8     # L = 128, W*D = 128 (lane-dense image view)
    L = H * W

    key = jax.random.PRNGKey(0)
    ks = jax.random.split(key, 12)
    x = jax.random.normal(ks[0], (B, L, D), jnp.float32)

    # Deterministic synthetic parameters (shapes from Feature_Enhance.__init__).
    ln_g = 1.0 + 0.05 * jax.random.normal(ks[1], (1, D), jnp.float32)   # ln1.weight
    ln_b = 0.05 * jax.random.normal(ks[2], (1, D), jnp.float32)         # ln1.bias
    w_t = jax.random.normal(ks[3], (D, D), jnp.float32) / jnp.sqrt(D)   # linear1.weight.T
    lb = 0.05 * jax.random.normal(ks[4], (1, D), jnp.float32)           # linear1.bias
    bn1_g = 1.0 + 0.05 * jax.random.normal(ks[5], (1, D), jnp.float32)  # bn1.weight
    bn1_b = 0.05 * jax.random.normal(ks[6], (1, D), jnp.float32)        # bn1.bias
    cw = jax.random.normal(ks[7], (3, 3, D), jnp.float32) / 3.0         # conv1.weight (D,1,3,3)->(3,3,D)
    cb = 0.05 * jax.random.normal(ks[8], (1, D), jnp.float32)           # conv1.bias
    nm_g = 1.0 + 0.05 * jax.random.normal(ks[9], (1, D), jnp.float32)   # norm.weight
    nm_b = 0.05 * jax.random.normal(ks[10], (1, D), jnp.float32)        # norm.bias

    params = (ln_g, ln_b, w_t, lb, bn1_g, bn1_b, cw, cb, nm_g, nm_b)
    out = feature_enhance(x, H, W, params)
    jax.block_until_ready(out)
    assert out.shape == (B, L, D) and out.dtype == jnp.float32
    assert bool(jnp.all(jnp.isfinite(out)))
    print("KERNEL_OK")
</pallas_src>

<mosaic_0001>
module attributes {stable_mosaic.version = 11 : i64} {
  func.func @_stats_kernel(%arg0: i32, %arg1: i32, %arg2: memref<1x16x128xf32, #tpu.memory_space<vmem>>, %arg3: memref<1x128xf32, #tpu.memory_space<vmem>>, %arg4: memref<1x128xf32, #tpu.memory_space<vmem>>, %arg5: memref<128x128xf32, #tpu.memory_space<vmem>>, %arg6: memref<1x128xf32, #tpu.memory_space<vmem>>, %arg7: memref<128x128xf32, #tpu.memory_space<vmem>>, %arg8: memref<1x16x128xf32, #tpu.memory_space<vmem>>, %arg9: memref<1x2x128xf32, #tpu.memory_space<vmem>>, %arg10: memref<1x2x128xf32, #tpu.memory_space<vmem>>) attributes {dimension_semantics = [#tpu.dimension_semantics<parallel>, #tpu.dimension_semantics<arbitrary>], iteration_bounds = array<i64: 2, 1>, scalar_prefetch = 0 : i64, scratch_operands = 0 : i64, tpu.core_type = #tpu.core_type<tc>, window_params = [{transform_indices = @transform_0, window_bounds = array<i64: 1, 16, 128>}, {pipeline_mode = #tpu.pipeline_mode<synchronous>, transform_indices = @transform_1, window_bounds = array<i64: 1, 128>}, {pipeline_mode = #tpu.pipeline_mode<synchronous>, transform_indices = @transform_2, window_bounds = array<i64: 1, 128>}, {pipeline_mode = #tpu.pipeline_mode<synchronous>, transform_indices = @transform_3, window_bounds = array<i64: 128, 128>}, {pipeline_mode = #tpu.pipeline_mode<synchronous>, transform_indices = @transform_4, window_bounds = array<i64: 1, 128>}, {pipeline_mode = #tpu.pipeline_mode<synchronous>, transform_indices = @transform_5, window_bounds = array<i64: 128, 128>}, {transform_indices = @transform_6, window_bounds = array<i64: 1, 16, 128>}, {transform_indices = @transform_7, window_bounds = array<i64: 1, 2, 128>}, {transform_indices = @transform_8, window_bounds = array<i64: 1, 2, 128>}]} {
    %c0_i32 = arith.constant 0 : i32
    %0 = arith.cmpi eq, %arg1, %c0_i32 : i32
    %1 = arith.extui %0 : i1 to i32
    %c0_i32_0 = arith.constant 0 : i32
    %2 = arith.cmpi ne, %1, %c0_i32_0 : i32
    scf.if %2 {
      %cst_52 = arith.constant 0xFF800000 : f32
      %106 = vector.broadcast %cst_52 : f32 to vector<1x128xf32>
      %cst_53 = arith.constant 0.000000e+00 : f32
      %107 = vector.broadcast %cst_53 : f32 to vector<1x128xf32>
      %108 = tpu.concatenate %106, %107 in 0 : vector<1x128xf32>, vector<1x128xf32> -> vector<2x128xf32>
      %c0_54 = arith.constant 0 : index
      %c0_55 = arith.constant 0 : index
      %c0_56 = arith.constant 0 : index
      %109 = vector.load %arg9[%c0_54, %c0_55, %c0_56] : memref<1x2x128xf32, #tpu.memory_space<vmem>>, vector<1x2x128xf32>
      %110 = vector.shape_cast %109 : vector<1x2x128xf32> to vector<2x128xf32>
      %111 = vector.shape_cast %108 : vector<2x128xf32> to vector<1x2x128xf32>
      tpu.vector_store %arg9[%c0_54, %c0_55, %c0_56], %111 {strides = array<i32>} : memref<1x2x128xf32, #tpu.memory_space<vmem>>, vector<1x2x128xf32>,
      %cst_57 = arith.constant 0.000000e+00 : f32
      %112 = vector.broadcast %cst_57 : f32 to vector<2x128xf32>
      %c0_58 = arith.constant 0 : index
      %c0_59 = arith.constant 0 : index
      %c0_60 = arith.constant 0 : index
      %113 = vector.load %arg10[%c0_58, %c0_59, %c0_60] : memref<1x2x128xf32, #tpu.memory_space<vmem>>, vector<1x2x128xf32>
      %114 = vector.shape_cast %113 : vector<1x2x128xf32> to vector<2x128xf32>
      %115 = vector.shape_cast %112 : vector<2x128xf32> to vector<1x2x128xf32>
      tpu.vector_store %arg10[%c0_58, %c0_59, %c0_60], %115 {strides = array<i32>} : memref<1x2x128xf32, #tpu.memory_space<vmem>>, vector<1x2x128xf32>,
    } else {
    }
    %c0 = arith.constant 0 : index
    %c0_1 = arith.constant 0 : index
    %c0_2 = arith.constant 0 : index
    %3 = vector.load %arg2[%c0, %c0_1, %c0_2] : memref<1x16x128xf32, #tpu.memory_space<vmem>>, vector<1x16x128xf32>
    %4 = vector.shape_cast %3 : vector<1x16x128xf32> to vector<16x128xf32>
    %cst = arith.constant dense<0.000000e+00> : vector<128xf32>
    %5 = vector.multi_reduction <add>, %4, %cst [0] : vector<16x128xf32> to vector<128xf32>
    %6 = vector.shape_cast %5 : vector<128xf32> to vector<1x128xf32>
    %7 = arith.mulf %4, %4 : vector<16x128xf32>
    %cst_3 = arith.constant dense<0.000000e+00> : vector<128xf32>
    %8 = vector.multi_reduction <add>, %7, %cst_3 [0] : vector<16x128xf32> to vector<128xf32>
    %9 = vector.shape_cast %8 : vector<128xf32> to vector<1x128xf32>
    %c0_4 = arith.constant 0 : index
    %c0_5 = arith.constant 0 : index
    %c0_6 = arith.constant 0 : index
    %10 = vector.load %arg10[%c0_4, %c0_5, %c0_6] : memref<1x2x128xf32, #tpu.memory_space<vmem>>, vector<1x2x128xf32>
    %11 = vector.shape_cast %10 : vector<1x2x128xf32> to vector<2x128xf32>
    %12 = tpu.concatenate %6, %9 in 0 : vector<1x128xf32>, vector<1x128xf32> -> vector<2x128xf32>
    %13 = arith.addf %11, %12 : vector<2x128xf32>
    %c0_7 = arith.constant 0 : index
    %c0_8 = arith.constant 0 : index
    %c0_9 = arith.constant 0 : index
    %14 = vector.load %arg10[%c0_7, %c0_8, %c0_9] : memref<1x2x128xf32, #tpu.memory_space<vmem>>, vector<1x2x128xf32>
    %15 = vector.shape_cast %14 : vector<1x2x128xf32> to vector<2x128xf32>
    %16 = vector.shape_cast %13 : vector<2x128xf32> to vector<1x2x128xf32>
    tpu.vector_store %arg10[%c0_7, %c0_8, %c0_9], %16 {strides = array<i32>} : memref<1x2x128xf32, #tpu.memory_space<vmem>>, vector<1x2x128xf32>,
    %c0_10 = arith.constant 0 : index
    %c0_11 = arith.constant 0 : index
    %17 = vector.load %arg7[%c0_10, %c0_11] : memref<128x128xf32, #tpu.memory_space<vmem>>, vector<128x128xf32>
    %cst_12 = arith.constant dense<0.000000e+00> : vector<16x128xf32>
    %18 = tpu.matmul %4, %17, %cst_12 {dimension_numbers = #tpu.dot_dimension_numbers<[1], [0], [0], [1], [0, 0, 1, 1], [], []>} : vector<16x128xf32>, vector<128x128xf32>, vector<16x128xf32> -> vector<16x128xf32>
    %cst_13 = arith.constant 6.250000e-02 : f32
    %19 = vector.broadcast %cst_13 : f32 to vector<16x128xf32>
    %20 = arith.mulf %18, %19 : vector<16x128xf32>
    %21 = arith.mulf %4, %4 : vector<16x128xf32>
    %cst_14 = arith.constant dense<0.000000e+00> : vector<16x128xf32>
    %22 = tpu.matmul %21, %17, %cst_14 {dimension_numbers = #tpu.dot_dimension_numbers<[1], [0], [0], [1], [0, 0, 1, 1], [], []>} : vector<16x128xf32>, vector<128x128xf32>, vector<16x128xf32> -> vector<16x128xf32>
    %cst_15 = arith.constant 6.250000e-02 : f32
    %23 = vector.broadcast %cst_15 : f32 to vector<16x128xf32>
    %24 = arith.mulf %22, %23 : vector<16x128xf32>
    %25 = arith.subf %4, %20 : vector<16x128xf32>
    %26 = arith.mulf %20, %20 : vector<16x128xf32>
    %27 = arith.subf %24, %26 : vector<16x128xf32>
    %cst_16 = arith.constant 9.99999997E-7 : f32
    %28 = vector.broadcast %cst_16 : f32 to vector<16x128xf32>
    %29 = arith.addf %27, %28 : vector<16x128xf32>
    %30 = math.rsqrt %29 : vector<16x128xf32>
    %31 = arith.mulf %25, %30 : vector<16x128xf32>
    %c0_17 = arith.constant 0 : index
    %c0_18 = arith.constant 0 : index
    %32 = vector.load %arg3[%c0_17, %c0_18] : memref<1x128xf32, #tpu.memory_space<vmem>>, vector<1x128xf32>
    %33 = vector.broadcast %32 : vector<1x128xf32> to vector<16x128xf32>
    %34 = arith.mulf %31, %33 : vector<16x128xf32>
    %c0_19 = arith.constant 0 : index
    %c0_20 = arith.constant 0 : index
    %35 = vector.load %arg4[%c0_19, %c0_20] : memref<1x128xf32, #tpu.memory_space<vmem>>, vector<1x128xf32>
    %36 = vector.broadcast %35 : vector<1x128xf32> to vector<16x128xf32>
    %37 = arith.addf %34, %36 : vector<16x128xf32>
    %cst_21 = arith.constant 5.000000e-01 : f32
    %38 = vector.broadcast %cst_21 : f32 to vector<16x128xf32>
    %39 = arith.mulf %38, %37 : vector<16x128xf32>
    %cst_22 = arith.constant 0.707106769 : f32
    %40 = vector.broadcast %cst_22 : f32 to vector<16x128xf32>
    %41 = arith.mulf %37, %40 : vector<16x128xf32>
    %42 = math.absf %41 : vector<16x128xf32>
    %cst_23 = arith.constant 0.327591091 : f32
    %43 = vector.broadcast %cst_23 : f32 to vector<16x128xf32>
    %44 = arith.mulf %43, %42 : vector<16x128xf32>
    %cst_24 = arith.constant 1.000000e+00 : f32
    %45 = vector.broadcast %cst_24 : f32 to vector<16x128xf32>
    %46 = arith.addf %45, %44 : vector<16x128xf32>
    %cst_25 = arith.constant 1.000000e+00 : f32
    %47 = vector.broadcast %cst_25 : f32 to vector<16x128xf32>
    %48 = arith.divf %47, %46 : vector<16x128xf32>
    %cst_26 = arith.constant 1.06140542 : f32
    %49 = vector.broadcast %cst_26 : f32 to vector<16x128xf32>
    %50 = arith.mulf %49, %48 : vector<16x128xf32>
    %cst_27 = arith.constant -1.45315206 : f32
    %51 = vector.broadcast %cst_27 : f32 to vector<16x128xf32>
    %52 = arith.addf %50, %51 : vector<16x128xf32>
    %53 = arith.mulf %52, %48 : vector<16x128xf32>
    %cst_28 = arith.constant 1.42141378 : f32
    %54 = vector.broadcast %cst_28 : f32 to vector<16x128xf32>
    %55 = arith.addf %53, %54 : vector<16x128xf32>
    %56 = arith.mulf %55, %48 : vector<16x128xf32>
    %cst_29 = arith.constant -0.284496725 : f32
    %57 = vector.broadcast %cst_29 : f32 to vector<16x128xf32>
    %58 = arith.addf %56, %57 : vector<16x128xf32>
    %59 = arith.mulf %58, %48 : vector<16x128xf32>
    %cst_30 = arith.constant 0.254829586 : f32
    %60 = vector.broadcast %cst_30 : f32 to vector<16x128xf32>
    %61 = arith.addf %59, %60 : vector<16x128xf32>
    %62 = arith.mulf %61, %48 : vector<16x128xf32>
    %cst_31 = arith.constant 0.000000e+00 : f32
    %63 = vector.broadcast %cst_31 : f32 to vector<16x128xf32>
    %64 = arith.subf %63, %42 : vector<16x128xf32>
    %65 = arith.mulf %64, %42 : vector<16x128xf32>
    %66 = math.exp %65 : vector<16x128xf32>
    %67 = arith.mulf %62, %66 : vector<16x128xf32>
    %cst_32 = arith.constant 1.000000e+00 : f32
    %68 = vector.broadcast %cst_32 : f32 to vector<16x128xf32>
    %69 = arith.subf %68, %67 : vector<16x128xf32>
    %cst_33 = arith.constant 0.000000e+00 : f32
    %70 = vector.broadcast %cst_33 : f32 to vector<16x128xf32>
    %71 = arith.cmpf oge, %41, %70 : vector<16x128xf32>
    %cst_34 = arith.constant 0.000000e+00 : f32
    %72 = vector.broadcast %cst_34 : f32 to vector<16x128xf32>
    %73 = arith.subf %72, %69 : vector<16x128xf32>
    %74 = arith.select %71, %69, %73 : vector<16x128xi1>, vector<16x128xf32>
    %cst_35 = arith.constant 1.000000e+00 : f32
    %75 = vector.broadcast %cst_35 : f32 to vector<16x128xf32>
    %76 = arith.addf %75, %74 : vector<16x128xf32>
    %77 = arith.mulf %39, %76 : vector<16x128xf32>
    %c0_36 = arith.constant 0 : index
    %c0_37 = arith.constant 0 : index
    %78 = vector.load %arg5[%c0_36, %c0_37] : memref<128x128xf32, #tpu.memory_space<vmem>>, vector<128x128xf32>
    %cst_38 = arith.constant dense<0.000000e+00> : vector<16x128xf32>
    %79 = tpu.matmul %77, %78, %cst_38 {dimension_numbers = #tpu.dot_dimension_numbers<[1], [0], [0], [1], [0, 0, 1, 1], [], []>} : vector<16x128xf32>, vector<128x128xf32>, vector<16x128xf32> -> vector<16x128xf32>
    %c0_39 = arith.constant 0 : index
    %c0_40 = arith.constant 0 : index
    %80 = vector.load %arg6[%c0_39, %c0_40] : memref<1x128xf32, #tpu.memory_space<vmem>>, vector<1x128xf32>
    %81 = vector.broadcast %80 : vector<1x128xf32> to vector<16x128xf32>
    %82 = arith.addf %79, %81 : vector<16x128xf32>
    %c0_41 = arith.constant 0 : index
    %c0_42 = arith.constant 0 : index
    %c0_43 = arith.constant 0 : index
    %83 = vector.load %arg8[%c0_41, %c0_42, %c0_43] : memref<1x16x128xf32, #tpu.memory_space<vmem>>, vector<1x16x128xf32>
    %84 = vector.shape_cast %83 : vector<1x16x128xf32> to vector<16x128xf32>
    %85 = vector.shape_cast %82 : vector<16x128xf32> to vector<1x16x128xf32>
    tpu.vector_store %arg8[%c0_41, %c0_42, %c0_43], %85 {strides = array<i32>} : memref<1x16x128xf32, #tpu.memory_space<vmem>>, vector<1x16x128xf32>,
    %c0_44 = arith.constant 0 : index
    %c0_45 = arith.constant 0 : index
    %c0_46 = arith.constant 0 : index
    %86 = vector.load %arg9[%c0_44, %c0_45, %c0_46] : memref<1x2x128xf32, #tpu.memory_space<vmem>>, vector<1x2x128xf32>
    %87 = vector.shape_cast %86 : vector<1x2x128xf32> to vector<2x128xf32>
    %88 = vector.extract_strided_slice %87 {offsets = [0, 0], sizes = [1, 128], strides = [1, 1]} : vector<2x128xf32> to vector<1x128xf32>
    %89 = vector.extract_strided_slice %87 {offsets = [1, 0], sizes = [1, 128], strides = [1, 1]} : vector<2x128xf32> to vector<1x128xf32>
    %cst_47 = arith.constant dense<0xFF800000> : vector<128xf32>
    %90 = vector.multi_reduction <maximumf>, %82, %cst_47 [0] : vector<16x128xf32> to vector<128xf32>
    %91 = vector.shape_cast %90 : vector<128xf32> to vector<1x128xf32>
    %92 = arith.maximumf %88, %91 : vector<1x128xf32>
    %93 = vector.broadcast %92 : vector<1x128xf32> to vector<16x128xf32>
    %94 = arith.subf %82, %93 : vector<16x128xf32>
    %95 = math.exp %94 : vector<16x128xf32>
    %96 = arith.subf %88, %92 : vector<1x128xf32>
    %97 = math.exp %96 : vector<1x128xf32>
    %98 = arith.mulf %89, %97 : vector<1x128xf32>
    %cst_48 = arith.constant dense<0.000000e+00> : vector<128xf32>
    %99 = vector.multi_reduction <add>, %95, %cst_48 [0] : vector<16x128xf32> to vector<128xf32>
    %100 = vector.shape_cast %99 : vector<128xf32> to vector<1x128xf32>
    %101 = arith.addf %98, %100 : vector<1x128xf32>
    %102 = tpu.concatenate %92, %101 in 0 : vector<1x128xf32>, vector<1x128xf32> -> vector<2x128xf32>
    %c0_49 = arith.constant 0 : index
    %c0_50 = arith.constant 0 : index
    %c0_51 = arith.constant 0 : index
    %103 = vector.load %arg9[%c0_49, %c0_50, %c0_51] : memref<1x2x128xf32, #tpu.memory_space<vmem>>, vector<1x2x128xf32>
    %104 = vector.shape_cast %103 : vector<1x2x128xf32> to vector<2x128xf32>
    %105 = vector.shape_cast %102 : vector<2x128xf32> to vector<1x2x128xf32>
    tpu.vector_store %arg9[%c0_49, %c0_50, %c0_51], %105 {strides = array<i32>} : memref<1x2x128xf32, #tpu.memory_space<vmem>>, vector<1x2x128xf32>,
    return
  }
  func.func @transform_0(%arg0: i32, %arg1: i32) -> (i32, i32, i32) {
    %c0_i32 = arith.constant 0 : i32
    %c0_i32_0 = arith.constant 0 : i32
    return %arg0, %arg1, %c0_i32 : i32, i32, i32
  }
  func.func @transform_1(%arg0: i32, %arg1: i32) -> (i32, i32) {
    %c0_i32 = arith.constant 0 : i32
    %c0_i32_0 = arith.constant 0 : i32
    %c0_i32_1 = arith.constant 0 : i32
    return %c0_i32, %c0_i32_0 : i32, i32
  }
  func.func @transform_2(%arg0: i32, %arg1: i32) -> (i32, i32) {
    %c0_i32 = arith.constant 0 : i32
    %c0_i32_0 = arith.constant 0 : i32
    %c0_i32_1 = arith.constant 0 : i32
    return %c0_i32, %c0_i32_0 : i32, i32
  }
  func.func @transform_3(%arg0: i32, %arg1: i32) -> (i32, i32) {
    %c0_i32 = arith.constant 0 : i32
    %c0_i32_0 = arith.constant 0 : i32
    %c0_i32_1 = arith.constant 0 : i32
    return %c0_i32, %c0_i32_0 : i32, i32
  }
  func.func @transform_4(%arg0: i32, %arg1: i32) -> (i32, i32) {
    %c0_i32 = arith.constant 0 : i32
    %c0_i32_0 = arith.constant 0 : i32
    %c0_i32_1 = arith.constant 0 : i32
    return %c0_i32, %c0_i32_0 : i32, i32
  }
  func.func @transform_5(%arg0: i32, %arg1: i32) -> (i32, i32) {
    %c0_i32 = arith.constant 0 : i32
    %c0_i32_0 = arith.constant 0 : i32
    %c0_i32_1 = arith.constant 0 : i32
    return %c0_i32, %c0_i32_0 : i32, i32
  }
  func.func @transform_6(%arg0: i32, %arg1: i32) -> (i32, i32, i32) {
    %c0_i32 = arith.constant 0 : i32
    %c0_i32_0 = arith.constant 0 : i32
    return %arg0, %arg1, %c0_i32 : i32, i32, i32
  }
  func.func @transform_7(%arg0: i32, %arg1: i32) -> (i32, i32, i32) {
    %c0_i32 = arith.constant 0 : i32
    %c0_i32_0 = arith.constant 0 : i32
    %c0_i32_1 = arith.constant 0 : i32
    return %arg0, %c0_i32, %c0_i32_0 : i32, i32, i32
  }
  func.func @transform_8(%arg0: i32, %arg1: i32) -> (i32, i32, i32) {
    %c0_i32 = arith.constant 0 : i32
    %c0_i32_0 = arith.constant 0 : i32
    %c0_i32_1 = arith.constant 0 : i32
    return %arg0, %c0_i32, %c0_i32_0 : i32, i32, i32
  }
}

</mosaic_0001>

<bundles_post_ra>
// kernel: tpu_custom_call.1
= control target key start
LH: loop header
LB: loop body
LE: loop exit
PB: predicated region body
PF: predicated region fallthrough
CT: control target
= control target key end

     0   :  { %s1718_s0 = inlined_call_operand.hbm [shape: f32[2,16,128], index: 0, kind: input, shape index: {}]   ;;  %s1719_s1 = inlined_call_operand.hbm [shape: f32[1,128], index: 1, kind: input, shape index: {}]   ;;  %s1720_s2 = inlined_call_operand.vmem [shape: f32[1,128], index: 2, kind: input, shape index: {}]   ;;  %s1721_s3 = inlined_call_operand.hbm [shape: f32[128,128], index: 3, kind: input, shape index: {}]   ;;  %s1722_s4 = inlined_call_operand.vmem [shape: f32[1,128], index: 4, kind: input, shape index: {}]   ;;  %s1723_s5 = inlined_call_operand.hbm [shape: f32[128,128], index: 5, kind: input, shape index: {}]   ;;  %s1724_s6 = inlined_call_operand.hbm [shape: f32[2,16,128], index: 6, kind: output, shape index: {0}]   ;;  %s1725_s7 = inlined_call_operand.hbm [shape: f32[2,2,128], index: 7, kind: output, shape index: {1}]   ;;  %s1726_s8 = inlined_call_operand.hbm [shape: f32[2,2,128], index: 8, kind: output, shape index: {2}]  }
   0x1   :  { %1733 = sst [smem:[#allocation22_spill]] %s1719_s1 }
   0x2   :  { %1734 = sst [smem:[#allocation23_spill]] %s1721_s3 }
   0x3   :  { %1735 = sst [smem:[#allocation24_spill]] %s1723_s5 }
   0x4   :  { %14 = vsyncpa [#allocation3], 0 }
   0x5   :  { %16 = vsyncpa [#allocation3 + $0x1], 0 }
   0x6   :  { %17 = vsyncpa [#allocation6], 0 }
   0x7   :  { %18 = vsyncpa [#allocation9], 0 }
   0x8   :  { %19 = vsyncpa [#allocation4], 0 }
   0x9   :  { %21 = vsyncpa [#allocation4 + $0x1], 0 }
   0xa   :  { %22 = vsyncpa [#allocation12], 0 }
   0xb   :  { %24 = vsyncpa [#allocation12 + $0x1], 0  ;;  %s1443_s27 = smov 0   ;;  %s1445_s28 = smov 0  }
   0xc   :  { %s1447_s29 = smov 0   ;;  %s1449_s30 = smov 0  }
   0xd   :  { %s1451_s9 = smov 0   ;;  %s1453_s10 = smov 0  }
   0xe LB: > { %1736 = sst [smem:[#allocation19_spill]] %s1368_s27  ;;  %s1474_s11 = sadd.s32 4294967295, %s1388_s10   ;;  %s1388_s10 = sphi %s1453_s10, %s30_s10   ;;  %s1384_s9 = sphi %s1451_s9, %s1758_s9   ;;  %s1380_s30 = sphi %s1449_s30, %s1757_s30   ;;  %s1376_s29 = sphi %s1447_s29, %s1756_s29   ;;  %s1372_s28 = sphi %s1445_s28, %s1755_s28   ;;  %s1368_s27 = sphi %s1443_s27, %s1754_s27  }
   0xf   : > { %s1727_s12 = sadd.s32 4294967294, %s1388_s10   ;;  %p64_p0 = scmp.ne.s32.totalorder %s1372_s28, %s1368_s27 }
  0x10   : > { %p65_p1 = scmp.eq.s32.totalorder %s1474_s11, 0  ;;  %p195_p2 = scmp.eq.s32.totalorder %s1474_s11, 1 }
  0x11   : > { %p201_p3 = scmp.eq.s32.totalorder %s1727_s12, 1  ;;  %p946_p5 = scmp.ge.s32.totalorder %s1388_s10, 1 }
  0x12   : > { %p1485_p4 = por %p65_p1, %p64_p0  ;;  %p260_p7 = scmp.lt.s32.totalorder %s1388_s10, 3 }
  0x13   : > { %p1490_p6 = por %p201_p3, %p64_p0  ;;  %s1740_s1 = sld [smem:[#allocation22_spill]] }
  0x14   : > { %p1498_p8 = pnand %p946_p5, %p260_p7  ;;  %p950_p9 = scmp.ge.s32.totalorder %s1388_s10, 2 }
  0x15   : > { %s1738_s14 = scalar_select %p1490_p6, 1, 0 }
  0x16   : > { %p1009_p10 = pneg %p1498_p8  ;;  %s1390_s19 = smov [#allocation5]  }
  0x17   : > { %1739 = sst [smem:[#allocation20_spill]] %s1738_s14  ;;  %s274_s20 = sshll.u32 %s1390_s19, 4  ;;  %s275_s20 = int_to_ptr.vmem [resolvable:$true] %s274_s20 }
  0x18   : > { %s1742_s3 = sld [smem:[#allocation23_spill]]  ;;  %p1510_p11 = pnand %p1009_p10, %p65_p1 }
  0x19   : > { %s272_s17 = sshll.u32 %s1740_s1, 4  ;;  %s1391_s25 = smov [#allocation7]   ;;  %s273_s17 = int_to_ptr.hbm [resolvable:$true] %s272_s17 }
  0x1a   : > { %s288_s26 = sshll.u32 %s1391_s25, 4  ;;  %s1728_s15 = smov 128   ;;  %s289_s26 = int_to_ptr.vmem [resolvable:$true] %s288_s26 }
  0x1b   : > { %1012 = dma.hbm_to_vmem [thread:$0]  (!%p1510_p11), %s273_s17, 16, %s275_s20, [#allocation6]  }
  0x1c   : > { %s1729_s16 = smov 8   ;;  %s1744_s5 = sld [smem:[#allocation24_spill]] }
  0x1d   : > { %s1394_s25 = smov [#allocation8]   ;;  %s51_s17 = sadd.s32 1, %s1376_s29 }
  0x1e   : > { %s286_s23 = sshll.u32 %s1742_s3, 4  ;;  %s305_s12 = sshll.u32 %s1394_s25, 4  ;;  %s287_s23 = int_to_ptr.hbm [resolvable:$true] %s286_s23  ;;  %s306_s12 = int_to_ptr.vmem [resolvable:$true] %s305_s12 }
  0x1f   : > { %1015 = dma.hbm_to_vmem [thread:$0]  (!%p1510_p11), %s287_s23, 2048, %s289_s26, [#allocation6], %s1728_s15, %s1728_s15, %s1729_s16  }
  0x20   : > { %s42_s20 = sadd.s32 1, %s1384_s9  ;;  %p58_p12 = scmp.ne.s32.totalorder %s1376_s29, %s1372_s28 }
  0x21   : > { %p44_p13 = scmp.ge.s32.totalorder %s42_s20, 2  ;;  %p59_p0 = scmp.eq.s32.totalorder %s1388_s10, 0 }
  0x22   : > { %s303_s22 = sshll.u32 %s1744_s5, 4  ;;  %p1536_p3 = por %p195_p2, %p58_p12  ;;  %s304_s22 = int_to_ptr.hbm [resolvable:$true] %s303_s22 }
  0x23   : > { %1018 = dma.hbm_to_vmem [thread:$0]  (!%p1510_p11), %s304_s22, 2048, %s306_s12, [#allocation9], %s1728_s15, %s1728_s15, %s1729_s16  }
  0x24   : > { %p1036_p5 = scmp.lt.s32.totalorder %s1388_s10, 2  ;;  %s1760_s20 = smov (%p44_p13, %s42_s20), 0 }
  0x25   : > { %1746 = sst [smem:[#allocation21_spill]] %s1760_s20  ;;  %p1543_p7 = por %p59_p0, %p58_p12 }
  0x26   : > { %s319_s12 = sand.u32 1, %s1376_s29   ;;  %s46_s26 = ssub.s32 %s1384_s9, %s1760_s20 }
  0x27   : > { %p49_p10 = scmp.eq.s32.totalorder %s46_s26, 0  ;;  %s951_s19 = sshll.u32 %s319_s12, 4 }
  0x28   : > { %s971_s21 = sshll.u32 %s1384_s9, 4  ;;  %s323_s1 = scalar_lea.vmem [#allocation2], %s951_s19 }
  0x29   : > { %s1552_s22 = scalar_select %p49_p10, %s1376_s29, %s51_s17  }
  0x2a   : > { %s330_s16 = scalar_lea.hbm %s1718_s0, %s971_s21  ;;  %s333_s3 = sshll.u32 %s323_s1, 4  ;;  %s334_s3 = int_to_ptr.vmem [resolvable:$true] %s333_s3 }
  0x2b   : > { %s331_s5 = sshll.u32 %s330_s16, 4  ;;  %p1020_p2 = pnand %p1036_p5, %p1543_p7  ;;  %s332_s5 = int_to_ptr.hbm [resolvable:$true] %s331_s5 }
  0x2c   : > { %s320_s14 = scalar_lea.sflag [#allocation3], %s319_s12  ;;  %s1748_s27 = smov 8  }
  0x2d   : > { %s1749_s20 = smov 128   ;;  %345 = sbr.rel (%p1498_p8) target bundleno = 503 (0x1f7), region = 44 }
  0x2e   : > { %1022 = dma.hbm_to_vmem [thread:$0]  (!%p1020_p2), %s332_s5, 256, %s334_s3, %s320_s14, %s1749_s20, %s1749_s20, %s1748_s27  }
  0x2f   : > { %s1567_s15 = sand.u32 (!%p1498_p8), 1, %s1372_s28  }
  0x30   : > { %s955_s1 = sshll.u32 (!%p1498_p8), %s1567_s15, 4  ;;  %s348_s16 = scalar_lea.sflag (!%p1498_p8), [#allocation3], %s1567_s15 }
  0x31   : > { %s351_s17 = scalar_lea.vmem (!%p1498_p8), [#allocation2], %s955_s1 }
  0x32   : > { %1347 = dma.done.wait (%p1485_p4), %s348_s16, 256  }
  0x33   : > { %1349 = vsyncadd (%p1485_p4), %s348_s16, 4294967040 }
  0x34   : > { %1351 = dma.done.wait (%p65_p1), [#allocation6], 2064  }
  0x35   : > { %1353 = vsyncadd (%p65_p1), [#allocation6], 4294965232 }
  0x36   : > { %1355 = dma.done.wait (%p65_p1), [#allocation9], 2048  }
  0x37   : > { %1357 = vsyncadd (%p65_p1), [#allocation9], 4294965248  ;;  %v458_v0 = vld [vmem:[#allocation8 + $0x78] sm:$0xff]  ;;  %v457_v1 = vld [vmem:[#allocation8 + $0x70] sm:$0xff]  ;;  %s960_s27 = sshll.u32 %s1567_s15, 1  ;;  %s972_s24 = sshll.u32 %s1380_s30, 4 }
  0x38   : > { %459 = vmatpush.msra.mxu0 %v458_v0  ;;  %973 = vmatpush.msra.mxu3 %v458_v0  ;;  %v456_v2 = vld [vmem:[#allocation8 + $0x68] sm:$0xff]  ;;  %v455_v3 = vld [vmem:[#allocation8 + $0x60] sm:$0xff]  ;;  %v454_v4 = vld [vmem:[#allocation8 + $0x58] sm:$0xff]  ;;  %s1620_s13 = scalar_lea.vmem [#allocation13], %s960_s27  ;;  %s1623_s14 = scalar_lea.vmem [#allocation11], %s960_s27 }
  0x39   : > { %484 = vmatpush.msra.mxu1 %v458_v0  ;;  %v1585_v5 = vld [vmem:[%s351_s17] sm:$0xff]  ;;  %v1587_v6 = vld [vmem:[%s351_s17 + $0x8] sm:$0xff]  ;;  %s395_s12 = scalar_lea.vmem [#allocation10], %s955_s1  ;;  %s733_s21 = scalar_lea.hbm %s1724_s6, %s972_s24 }
  0x3a   : > { %460 = vmatpush.msra.mxu0 %v457_v1  ;;  %974 = vmatpush.msra.mxu3 %v457_v1  ;;  %v429_v7 = vmul.f32 %v1585_v5, %v1585_v5  ;;  %v430_v8 = vmul.f32 %v1587_v6, %v1587_v6  ;;  %v453_v9 = vld [vmem:[#allocation8 + $0x50] sm:$0xff]  ;;  %v452_v11 = vld [vmem:[#allocation8 + $0x48] sm:$0xff]  ;;  %v451_v12 = vld [vmem:[#allocation8 + $0x40] sm:$0xff]  ;;  %s734_s25 = sshll.u32 %s395_s12, 4  ;;  %s736_s16 = sshll.u32 %s733_s21, 4  ;;  %s735_s25 = int_to_ptr.vmem [resolvable:$true] %s734_s25  ;;  %s737_s16 = int_to_ptr.hbm [resolvable:$true] %s736_s16 }
  0x3b   : > { %485 = vmatpush.msra.mxu1 %v457_v1  ;;  %v450_v13 = vld [vmem:[#allocation8 + $0x38] sm:$0xff]  ;;  %v449_v14 = vld [vmem:[#allocation8 + $0x30] sm:$0xff]  ;;  %v448_v15 = vld [vmem:[#allocation8 + $0x28] sm:$0xff]  ;;  %s710_s17 = scalar_lea.sflag [#allocation4], %s1567_s15  ;;  %s1252_s1 = sshra.s32 %s737_s16, 4  ;;  %s1253_s1 = int_to_ptr.hbm [resolvable:$true] %s1252_s1 }
  0x3c   : > { %461 = vmatpush.msra.mxu0 %v456_v2  ;;  %975 = vmatpush.msra.mxu3 %v456_v2  ;;  %v1593_v10 = vadd.f32 %v430_v8, %v429_v7  ;;  %v447_v16 = vld [vmem:[#allocation8 + $0x20] sm:$0xff]  ;;  %v446_v17 = vld [vmem:[#allocation8 + $0x18] sm:$0xff]  ;;  %v445_v18 = vld [vmem:[#allocation8 + $0x10] sm:$0xff]  ;;  %s1254_s3 = scalar_lea.hbm %s1253_s1, 16  ;;  %s1258_s18 = scalar_lea.hbm %s1724_s6, 32 }
  0x3d   : > { %486 = vmatpush.msra.mxu1 %v456_v2  ;;  %v444_v19 = vld [vmem:[#allocation8 + $0x8] sm:$0xff]  ;;  %v443_v20 = vld [vmem:[#allocation8] sm:$0xff]  ;;  %v646_v24 = vld [vmem:[#allocation7 + $0x78] sm:$0xff]  ;;  %p1255_p1 = scmp.ne.s32.totalorder %s1253_s1, %s1254_s3  ;;  %p1259_p11 = scmp.lt.s32.totalorder %s1253_s1, %s1724_s6 }
  0x3e   : > { %462 = vmatpush.msra.mxu0 %v455_v3  ;;  %976 = vmatpush.msra.mxu3 %v455_v3  ;;  %v645_v25 = vld [vmem:[#allocation7 + $0x70] sm:$0xff]  ;;  %v644_v28 = vld [vmem:[#allocation7 + $0x68] sm:$0xff]  ;;  %v643_v30 = vld [vmem:[#allocation7 + $0x60] sm:$0xff]  ;;  %p1260_p12 = scmp.lt.s32.totalorder %s1258_s18, %s1254_s3 }
  0x3f   : > { %487 = vmatpush.msra.mxu1 %v455_v3  ;;  %651 = vmatpush.msra.mxu2 %v646_v24  ;;  %v642_v33 = vld [vmem:[#allocation7 + $0x58] sm:$0xff]  ;;  %v641_v36 = vld [vmem:[#allocation7 + $0x50] sm:$0xff]  ;;  %v640_v39 = vld [vmem:[#allocation7 + $0x48] sm:$0xff]  ;;  %p1256_p4 = pnand %p1255_p1, %p1536_p3 }
  0x40   : > { %463 = vmatpush.msra.mxu0 %v454_v4  ;;  %977 = vmatpush.msra.mxu3 %v454_v4  ;;  %v639_v41 = vld [vmem:[#allocation7 + $0x40] sm:$0xff]  ;;  %v638_v44 = vld [vmem:[#allocation7 + $0x38] sm:$0xff]  ;;  %v637_v46 = vld [vmem:[#allocation7 + $0x30] sm:$0xff]  ;;  %p1261_p13 = por %p1260_p12, %p1259_p11 }
  0x41   : > { %488 = vmatpush.msra.mxu1 %v454_v4  ;;  %652 = vmatpush.msra.mxu2 %v645_v25  ;;  %v636_v48 = vld [vmem:[#allocation7 + $0x28] sm:$0xff]  ;;  %v635_v50 = vld [vmem:[#allocation7 + $0x20] sm:$0xff]  ;;  %v634_v54 = vld [vmem:[#allocation7 + $0x18] sm:$0xff]  ;;  %p1257_p8 = pneg %p1256_p4 }
  0x42   : > { %464 = vmatpush.msra.mxu0 %v453_v9  ;;  %978 = vmatpush.msra.mxu3 %v453_v9  ;;  %v633_v58 = vld [vmem:[#allocation7 + $0x10] sm:$0xff]  ;;  %v1097_v59 = vld [vmem:[#allocation5] ss:$0 sm:$0xff]  ;;  %v632_v62 = vld [vmem:[#allocation7 + $0x8] sm:$0xff] }
  0x43   : > { %489 = vmatpush.msra.mxu1 %v453_v9  ;;  %653 = vmatpush.msra.mxu2 %v644_v28  ;;  %v1098_v0 = vld [vmem:[%s1720_s2] ss:$0 sm:$0xff]  ;;  %v631_v2 = vld [vmem:[#allocation7] sm:$0xff]  ;;  %p1262_p0 = pnand %p1261_p13, %p1257_p8 }
  0x44   : > { %465 = vmatpush.msra.mxu0 %v452_v11  ;;  %979 = vmatpush.msra.mxu3 %v452_v11 }
  0x45   : > { %490 = vmatpush.msra.mxu1 %v452_v11  ;;  %654 = vmatpush.msra.mxu2 %v643_v30 }
  0x46   : > { %466 = vmatpush.msra.mxu0 %v451_v12  ;;  %980 = vmatpush.msra.mxu3 %v451_v12 }
  0x47   : > { %491 = vmatpush.msra.mxu1 %v451_v12  ;;  %655 = vmatpush.msra.mxu2 %v642_v33 }
  0x48   : > { %467 = vmatpush.msra.mxu0 %v450_v13  ;;  %981 = vmatpush.msra.mxu3 %v450_v13 }
  0x49   : > { %492 = vmatpush.msra.mxu1 %v450_v13  ;;  %656 = vmatpush.msra.mxu2 %v641_v36 }
  0x4a   : > { %468 = vmatpush.msra.mxu0 %v449_v14  ;;  %982 = vmatpush.msra.mxu3 %v449_v14 }
  0x4b   : > { %493 = vmatpush.msra.mxu1 %v449_v14  ;;  %657 = vmatpush.msra.mxu2 %v640_v39 }
  0x4c   : > { %469 = vmatpush.msra.mxu0 %v448_v15  ;;  %983 = vmatpush.msra.mxu3 %v448_v15 }
  0x4d   : > { %494 = vmatpush.msra.mxu1 %v448_v15  ;;  %658 = vmatpush.msra.mxu2 %v639_v41 }
  0x4e   : > { %470 = vmatpush.msra.mxu0 %v447_v16  ;;  %984 = vmatpush.msra.mxu3 %v447_v16 }
  0x4f   : > { %495 = vmatpush.msra.mxu1 %v447_v16  ;;  %659 = vmatpush.msra.mxu2 %v638_v44 }
  0x50   : > { %471 = vmatpush.msra.mxu0 %v446_v17  ;;  %985 = vmatpush.msra.mxu3 %v446_v17 }
  0x51   : > { %496 = vmatpush.msra.mxu1 %v446_v17  ;;  %660 = vmatpush.msra.mxu2 %v637_v46 }
  0x52   : > { %472 = vmatpush.msra.mxu0 %v445_v18  ;;  %986 = vmatpush.msra.mxu3 %v445_v18 }
  0x53   : > { %497 = vmatpush.msra.mxu1 %v445_v18  ;;  %661 = vmatpush.msra.mxu2 %v636_v48 }
  0x54   : > { %473 = vmatpush.msra.mxu0 %v444_v19  ;;  %987 = vmatpush.msra.mxu3 %v444_v19 }
  0x55   : > { %498 = vmatpush.msra.mxu1 %v444_v19  ;;  %662 = vmatpush.msra.mxu2 %v635_v50 }
  0x56   : > { %474 = vmatpush.msra.mxu0 %v443_v20  ;;  %988 = vmatpush.msra.mxu3 %v443_v20 }
  0x57   : > { %499 = vmatpush.msra.mxu1 %v443_v20  ;;  %475 = vmatmul.f32.vlgmr.msra.gmra.mxu0 %v1585_v5 }
  0x58   : > { %478 = vmatmul.f32.vlgmr.msra.gmra.mxu3 %v1587_v6  ;;  %500 = vmatmul.f32.vlgmr.msra.gmra.mxu1 %v429_v7 }
  0x59   : > { %663 = vmatpush.msra.mxu2 %v634_v54 }
  0x5b   : > { %664 = vmatpush.msra.mxu2 %v633_v58 }
  0x5d   : > { %665 = vmatpush.msra.mxu2 %v632_v62 }
  0x5f   : > { %666 = vmatpush.msra.mxu2 %v631_v2 }
  0x60   : > { %503 = vmatmul.f32.gmra.mxu1 %v430_v8 }
  0xd4   : > { %v476_v21 = vpop.f32.mrf.mxu0 }
  0xd5   : > { %v482_v22 = vmul.f32 0.0625, %v476_v21  ;;  %v501_v23 = vpop.f32.mrf.mxu1 }
  0xd6   : > { %v507_v26 = vmul.f32 0.0625, %v501_v23 }
  0xd7   : > { %v511_v27 = vmul.f32 %v482_v22, %v482_v22  ;;  %v509_v56 = vsub.f32 %v1585_v5, %v482_v22 }
  0xd9   : > { %v513_v29 = vsub.f32 %v507_v26, %v511_v27 }
  0xdb   : > { %v515_v31 = vadd.f32 1e-06, %v513_v29  ;;  %v479_v32 = vpop.f32.mrf.mxu3 }
  0xdc   : > { %v483_v34 = vmul.f32 0.0625, %v479_v32 }
  0xdd   : > { %1100 = vrsqrt.f32 %v515_v31  ;;  %v504_v35 = vpop.f32.mrf.mxu1  ;;  %vm523_vm1 = vweird.f32 %v515_v31 }
  0xde   : > { %v512_v37 = vmul.f32 %v483_v34, %v483_v34  ;;  %v508_v38 = vmul.f32 0.0625, %v504_v35  ;;  %v510_v8 = vsub.f32 %v1587_v6, %v483_v34 }
  0xe0   : > { %v514_v40 = vsub.f32 %v508_v38, %v512_v37 }
  0xe2   : > { %v516_v42 = vadd.f32 1e-06, %v514_v40 }
  0xe3   : > { %v1101_v43 = vpop.eup %1100 }
  0xe4   : > { %v518_v45 = vmul.f32 %v1101_v43, %v515_v31  ;;  %1102 = vrsqrt.f32 %v516_v42  ;;  %vm524_vm0 = vweird.f32 %v1101_v43  ;;  %vm533_vm4 = vweird.f32 %v516_v42 }
  0xe5   : > { %vm525_vm2 = vmor %vm523_vm1, %vm524_vm0  ;;  %vm416_vm0 = vcmask 1040384  }
  0xe6   : > { %v519_v47 = vmul.f32 %v1101_v43, %v518_v45 }
  0xe8   : > { %v520_v49 = vmul.f32 0.5, %v519_v47 }
  0xea   : > { %v1103_v51 = vpop.eup %1102  ;;  %v521_v52 = vsub.f32 1.5, %v520_v49 }
  0xeb   : > { %v528_v53 = vmul.f32 %v1103_v51, %v516_v42  ;;  %vm534_vm3 = vweird.f32 %v1103_v51 }
  0xec   : > { %v522_v55 = vmul.f32 %v1101_v43, %v521_v52  ;;  %vm535_vm5 = vmor %vm533_vm4, %vm534_vm3 }
  0xed   : > { %v529_v57 = vmul.f32 %v1103_v51, %v528_v53 }
  0xee   : > { %v526_v60 = vsel %vm525_vm2, %v1101_v43, %v522_v55 }
  0xef   : > { %v530_v61 = vmul.f32 0.5, %v529_v57  ;;  %v537_v63 = vmul.f32 %v526_v60, %v509_v56 }
  0xf1   : > { %v531_v1 = vsub.f32 1.5, %v530_v61  ;;  %v543_v3 = vmul.f32 %v1097_v59, %v537_v63 }
  0xf3   : > { %v532_v4 = vmul.f32 %v1103_v51, %v531_v1  ;;  %v1601_v7 = vadd.f32 %v1098_v0, %v543_v3 }
  0xf5   : > { %v536_v9 = vsel %vm535_vm5, %v1103_v51, %v532_v4  ;;  %v1605_v11 = vmul.f32 0.70710677, %v1601_v7 }
  0xf6   : > { %v538_v12 = vmul.f32 %v536_v9, %v510_v8 }
  0xf7   : > { %v555_v13 = vand.u32 2147483647, %v1605_v11  ;;  %vm621_vm14 = vcmp.ge.f32.partialorder %v1605_v11, 0.0 }
  0xf8   : > { %v544_v14 = vmul.f32 %v1097_v59, %v538_v12 }
  0xf9   : > { %v557_v15 = vmul.f32 0.3275911, %v555_v13  ;;  %v609_v34 = vsub.f32 0.0, %v555_v13 }
  0xfa   : > { %v1608_v16 = vadd.f32 %v1098_v0, %v544_v14 }
  0xfb   : > { %v559_v17 = vadd.f32 1.0, %v557_v15  ;;  %v611_v41 = vmul.f32 %v609_v34, %v555_v13  ;;  %v551_v13 = vmul.f32 0.5, %v1601_v7 }
  0xfc   : > { %v1611_v18 = vmul.f32 0.70710677, %v1608_v16 }
  0xfd   : > { %1104 = vrcp.f32 %v559_v17  ;;  %v572_v25 = vand.u32 2147483648, %v559_v17  ;;  %v570_v27 = vand.u32 2147483647, %v559_v17  ;;  %vm566_vm7 = vweird.f32 %v559_v17 }
  0xfe   : > { %v556_v19 = vand.u32 2147483647, %v1611_v18  ;;  %v613_v49 = vmul.f32 1.442695, %v611_v41  ;;  %vm622_vm15 = vcmp.ge.f32.partialorder %v1611_v18, 0.0 }
  0xff   : > { %v573_v30 = vor.u32 1.1754944e-38, %v572_v25  ;;  %vm571_vm9 = vcmp.eq.f32.partialorder %v570_v27, 8.507059e+37  ;;  %v1099_v18 = vld [vmem:[%s1722_s4] ss:$0 sm:$0xff] }
 0x100   : > { %v558_v20 = vmul.f32 0.3275911, %v556_v19  ;;  %v610_v48 = vsub.f32 0.0, %v556_v19 }
 0x102   : > { %v560_v21 = vadd.f32 1.0, %v558_v20  ;;  %v612_v54 = vmul.f32 %v610_v48, %v556_v19 }
 0x103   : > { %v1105_v22 = vpop.eup %1104 }
 0x104   : > { %v562_v23 = vmul.f32 %v1105_v22, %v559_v17  ;;  %1106 = vrcp.f32 %v560_v21  ;;  %vm567_vm6 = vweird.f32 %v1105_v22  ;;  %v587_v37 = vand.u32 2147483648, %v560_v21 }
 0x105   : > { %vm568_vm8 = vmor %vm566_vm7, %vm567_vm6  ;;  %v585_v39 = vand.u32 2147483647, %v560_v21  ;;  %vm581_vm11 = vweird.f32 %v560_v21  ;;  %1108 = vpow2.f32 %v613_v49  ;;  %v615_v59 = vmul.f32 1.442695, %v612_v54 }
 0x106   : > { %v563_v24 = vsub.f32 1.0, %v562_v23  ;;  %v588_v44 = vor.u32 1.1754944e-38, %v587_v37  ;;  %v552_v23 = vmul.f32 0.5, %v1608_v16  ;;  %v422_v16 = vadd.f32 %v1587_v6, %v1585_v5 }
 0x107   : > { %vm586_vm13 = vcmp.eq.f32.partialorder %v585_v39, 8.507059e+37  ;;  %1110 = vpow2.f32 %v615_v59 }
 0x108   : > { %v564_v26 = vmul.f32 %v1105_v22, %v563_v24  ;;  %v1395_v24 = vmov 0.0   ;;  %v423_v25 = vrot.slane %v422_v16, 4 }
 0x109   : > { %v417_v7 = vsel %vm416_vm0, -inf, %v1395_v24  ;;  %419 = vst [vmem:[%s1620_s13] sm:$0x3] %v1395_v24 }
 0x10a   : > { %v1107_v28 = vpop.eup %1106  ;;  %v565_v29 = vadd.f32 %v1105_v22, %v564_v26  ;;  %418 = vst [vmem:[%s1623_s14] sm:$0x3] %v417_v7  ;;  %v432_v26 = vrot.slane %v1593_v10, 4 }
 0x10b   : > { %v577_v31 = vmul.f32 %v1107_v28, %v560_v21  ;;  %vm582_vm10 = vweird.f32 %v1107_v28  ;;  %v1109_v62 = vpop.eup %1108 }
 0x10c   : > { %v569_v32 = vsel %vm568_vm8, %v1105_v22, %v565_v29  ;;  %vm583_vm12 = vmor %vm581_vm11, %vm582_vm10  ;;  %v424_v29 = vadd.f32 %v423_v25, %v422_v16 }
 0x10d   : > { %v574_v33 = vsel %vm571_vm9, %v573_v30, %v569_v32  ;;  %v578_v35 = vsub.f32 1.0, %v577_v31  ;;  %v1111_v9 = vpop.eup %1110  ;;  %v433_v30 = vadd.f32 %v432_v26, %v1593_v10 }
 0x10e   : > { %v591_v36 = vmul.f32 1.0614054, %v574_v33  ;;  %v425_v5 = vrot.slane %v424_v29, 2 }
 0x10f   : > { %v579_v38 = vmul.f32 %v1107_v28, %v578_v35  ;;  %v434_v6 = vrot.slane %v433_v30, 2 }
 0x110   : > { %v593_v40 = vadd.f32 -1.4531521, %v591_v36 }
 0x111   : > { %v580_v42 = vadd.f32 %v1107_v28, %v579_v38  ;;  %v435_v34 = vadd.f32 %v434_v6, %v433_v30 }
 0x112   : > { %v595_v43 = vmul.f32 %v593_v40, %v574_v33 }
 0x113   : > { %v584_v45 = vsel %vm583_vm12, %v1107_v28, %v580_v42 }
 0x114   : > { %v597_v46 = vadd.f32 1.4214138, %v595_v43  ;;  %v589_v47 = vsel %vm586_vm13, %v588_v44, %v584_v45 }
 0x115   : > { %v592_v50 = vmul.f32 1.0614054, %v589_v47 }
 0x116   : > { %v599_v51 = vmul.f32 %v597_v46, %v574_v33 }
 0x117   : > { %v594_v52 = vadd.f32 -1.4531521, %v592_v50 }
 0x118   : > { %v601_v53 = vadd.f32 -0.28449672, %v599_v51 }
 0x119   : > { %v596_v55 = vmul.f32 %v594_v52, %v589_v47 }
 0x11a   : > { %v603_v56 = vmul.f32 %v601_v53, %v574_v33 }
 0x11b   : > { %v598_v57 = vadd.f32 1.4214138, %v596_v55 }
 0x11c   : > { %v605_v58 = vadd.f32 0.2548296, %v603_v56 }
 0x11d   : > { %v600_v60 = vmul.f32 %v598_v57, %v589_v47 }
 0x11e   : > { %v607_v61 = vmul.f32 %v605_v58, %v574_v33  ;;  %v426_v33 = vadd.f32 %v425_v5, %v424_v29 }
 0x11f   : > { %v602_v63 = vadd.f32 -0.28449672, %v600_v60 }
 0x120   : > { %v617_v0 = vmul.f32 %v1109_v62, %v607_v61 }
 0x121   : > { %v604_v1 = vmul.f32 %v602_v63, %v589_v47 }
 0x122   : > { %v619_v2 = vsub.f32 1.0, %v617_v0 }
 0x123   : > { %v606_v3 = vadd.f32 0.2548296, %v604_v1 }
 0x124   : > { %v623_v4 = vsub.f32 0.0, %v619_v2 }
 0x125   : > { %v608_v8 = vmul.f32 %v606_v3, %v589_v47 }
 0x126   : > { %v625_v12 = vsel %vm621_vm14, %v619_v2, %v623_v4 }
 0x127   : > { %v627_v14 = vadd.f32 1.0, %v625_v12  ;;  %v618_v15 = vmul.f32 %v1111_v9, %v608_v8 }
 0x129   : > { %v629_v17 = vmul.f32 %v627_v14, %v551_v13  ;;  %v620_v19 = vsub.f32 1.0, %v618_v15 }
 0x12b   : > { %667 = vmatmul.f32.vlgmr.msra.gmra.mxu2 %v629_v17  ;;  %v624_v20 = vsub.f32 0.0, %v620_v19 }
 0x12d   : > { %v626_v21 = vsel %vm622_vm15, %v620_v19, %v624_v20 }
 0x12e   : > { %v628_v22 = vadd.f32 1.0, %v626_v21 }
 0x130   : > { %v630_v11 = vmul.f32 %v628_v22, %v552_v23 }
 0x133   : > { %670 = vmatmul.f32.gmra.mxu2 %v630_v11 }
 0x1ae   : > { %v668_v27 = vpop.f32.mrf.mxu2 }
 0x1af   : > { %v669_v28 = vadd.f32 %v1099_v18, %v668_v27 }
 0x1b1   : > { %674 = vst [vmem:[%s395_s12] sm:$0xff] %v669_v28 }
 0x1b6   : > { %v671_v31 = vpop.f32.mrf.mxu2 }
 0x1b7   : > { %v672_v32 = vadd.f32 %v1099_v18, %v671_v31 }
 0x1b9   : > { %675 = vst [vmem:[%s395_s12 + $0x8] sm:$0xff] %v672_v32  ;;  %v677_v10 = vmax.f32 %v669_v28, %v672_v32 }
 0x1ba   : > { %1265 = shalt.err (!%p1262_p0)
}
 0x1bb   : > { %s1396_s15 = smov 128   ;;  %s1397_s12 = smov 8   ;;  %v678_v35 = vrot.slane %v677_v10, 4  ;;  %v427_v36 = vrot.slane %v426_v33, 1  ;;  %v436_v37 = vrot.slane %v435_v34, 1 }
 0x1bc   : > { %1003 = dma.vmem_to_hbm [thread:$0]  (%p1536_p3), %s735_s25, 256, %s737_s16, %s710_s17, %s1396_s15, %s1396_s15, %s1397_s12  }
 0x1bd   : > { %v679_v38 = vmax.f32 %v677_v10, %v678_v35  ;;  %v428_v40 = vadd.f32 %v427_v36, %v426_v33  ;;  %v437_v41 = vadd.f32 %v436_v37, %v435_v34  ;;  %v676_v44 = vld [vmem:[%s1623_s14] sm:$0x3]  ;;  %v438_v48 = vld [vmem:[%s1620_s13] sm:$0x3]  ;;  %s967_s26 = sshll.u32 %s1380_s30, 1  ;;  %s714_s3 = sand.u32 1, %s1474_s11  }
 0x1be   : > { %s749_s25 = scalar_lea.hbm %s1725_s7, %s967_s26  ;;  %s763_s1 = scalar_lea.hbm %s1726_s8, %s967_s26 }
 0x1bf   : > { %v680_v39 = vrot.slane %v679_v38, 2  ;;  %v440_v45 = vsel %vm416_vm0, %v428_v40, %v437_v41  ;;  %s751_s5 = sshll.u32 %s1623_s14, 4  ;;  %s753_s27 = sshll.u32 %s749_s25, 4  ;;  %s752_s5 = int_to_ptr.vmem [resolvable:$true] %s751_s5  ;;  %s754_s27 = int_to_ptr.hbm [resolvable:$true] %s753_s27 }
 0x1c0   : > { %v441_v49 = vadd.f32 %v440_v45, %v438_v48  ;;  %s767_s18 = sshll.u32 %s763_s1, 4  ;;  %s765_s30 = sshll.u32 %s1620_s13, 4  ;;  %s1665_s30 = int_to_ptr.vmem [resolvable:$true] %s765_s30  ;;  %s1667_s18 = int_to_ptr.hbm [resolvable:$true] %s767_s18 }
 0x1c1   : > { %v681_v42 = vmax.f32 %v679_v38, %v680_v39  ;;  %s715_s20 = scalar_lea.sflag [#allocation12], %s714_s3  ;;  %s1280_s24 = sshra.s32 %s754_s27, 4  ;;  %s1281_s24 = int_to_ptr.hbm [resolvable:$true] %s1280_s24 }
 0x1c2   : > { %442 = vst [vmem:[%s1620_s13] sm:$0x3] %v441_v49  ;;  %s1282_s11 = scalar_lea.hbm %s1281_s24, 2  ;;  %s1286_s12 = scalar_lea.hbm %s1725_s7, 4 }
 0x1c3   : > { %v682_v43 = vrot.slane %v681_v42, 1  ;;  %p1283_p5 = scmp.ne.s32.totalorder %s1281_s24, %s1282_s11  ;;  %p1287_p2 = scmp.lt.s32.totalorder %s1281_s24, %s1725_s7 }
 0x1c4   : > { %p1288_p1 = scmp.lt.s32.totalorder %s1286_s12, %s1282_s11 }
 0x1c5   : > { %v683_v46 = vmax.f32 %v681_v42, %v682_v43  ;;  %p1284_p7 = pnand %p1283_p5, %p1536_p3 }
 0x1c6   : > { %p1289_p4 = por %p1288_p1, %p1287_p2 }
 0x1c7   : > { %v684_v47 = vmax.f32 %v676_v44, %v683_v46  ;;  %p1285_p10 = pneg %p1284_p7 }
 0x1c9   : > { %v685_v50 = vperm.slane %v684_v47, 0  ;;  %v692_v55 = vsub.f32 %v676_v44, %v684_v47  ;;  %p1290_p8 = pnand %p1289_p4, %p1285_p10 }
 0x1cb   : > { %v686_v51 = vsub.f32 %v669_v28, %v685_v50  ;;  %v687_v52 = vsub.f32 %v672_v32, %v685_v50  ;;  %v693_v56 = vmul.f32 1.442695, %v692_v55 }
 0x1cd   : > { %v688_v53 = vmul.f32 1.442695, %v686_v51  ;;  %v690_v54 = vmul.f32 1.442695, %v687_v52 }
 0x1cf   : > { %1112 = vpow2.f32 %v688_v53 }
 0x1d0   : > { %1114 = vpow2.f32 %v690_v54 }
 0x1d1   : > { %1116 = vpow2.f32 %v693_v56 }
 0x1d5   : > { %v1113_v57 = vpop.eup %1112 }
 0x1d6   : > { %v1115_v58 = vpop.eup %1114 }
 0x1d7   : > { %v699_v59 = vadd.f32 %v1115_v58, %v1113_v57  ;;  %v1117_v62 = vpop.eup %1116 }
 0x1d8   : > { %v696_v0 = vrot.slane %v1117_v62, 7 }
 0x1d9   : > { %v700_v60 = vrot.slane %v699_v59, 4 }
 0x1da   : > { %v698_v3 = vmul.f32 %v696_v0, %v676_v44 }
 0x1db   : > { %v701_v61 = vadd.f32 %v700_v60, %v699_v59 }
 0x1dd   : > { %v702_v63 = vrot.slane %v701_v61, 2 }
 0x1df   : > { %v703_v1 = vadd.f32 %v702_v63, %v701_v61 }
 0x1e1   : > { %v704_v2 = vrot.slane %v703_v1, 1 }
 0x1e3   : > { %v705_v4 = vadd.f32 %v704_v2, %v703_v1 }
 0x1e5   : > { %v706_v8 = vadd.f32 %v705_v4, %v698_v3 }
 0x1e7   : > { %v707_v9 = vsel %vm416_vm0, %v684_v47, %v706_v8 }
 0x1e8   : > { %708 = vst [vmem:[%s1623_s14] sm:$0x3] %v707_v9 }
 0x1e9   : > { %1293 = shalt.err (!%p1290_p8)
}
 0x1ea   : > { %1004 = dma.vmem_to_hbm [thread:$0]  (%p1536_p3), %s752_s5, 32, %s754_s27, %s715_s20  }
 0x1eb   : > { %s1308_s14 = sshra.s32 %s1667_s18, 4  ;;  %s1314_s17 = scalar_lea.hbm %s1726_s8, 4  ;;  %s1309_s14 = int_to_ptr.hbm [resolvable:$true] %s1308_s14 }
 0x1ec   : > { %s1310_s21 = scalar_lea.hbm %s1309_s14, 2  ;;  %p1315_p0 = scmp.lt.s32.totalorder %s1309_s14, %s1726_s8 }
 0x1ed   : > { %p1311_p11 = scmp.ne.s32.totalorder %s1309_s14, %s1310_s21  ;;  %p1316_p5 = scmp.lt.s32.totalorder %s1314_s17, %s1310_s21 }
 0x1ef   : > { %p1312_p12 = pnand %p1311_p11, %p1536_p3  ;;  %p1317_p7 = por %p1316_p5, %p1315_p0 }
 0x1f1   : > { %p1313_p13 = pneg %p1312_p12 }
 0x1f3   : > { %p1318_p10 = pnand %p1317_p7, %p1313_p13 }
 0x1f5   : > { %1321 = shalt.err (!%p1318_p10)
}
 0x1f6   : > { %1005 = dma.vmem_to_hbm [thread:$0]  (%p1536_p3), %s1665_s30, 32, %s1667_s18, %s715_s20  }
 0x1f7 PF: > { %s1750_s5 = sld [smem:[#allocation19_spill]]  ;;  %p1024_p2 = pnand %p950_p9, %p1490_p6 }
 0x1f9   : > { %p1025_p1 = pneg %p1024_p2 }
 0x1fd   : > { %s779_s24 = sand.u32 1, %s1750_s5  }
 0x1fe   : > { %s780_s11 = scalar_lea.sflag [#allocation4], %s779_s24 }
 0x1ff   : > { %1359 = dma.done.wait (%p1025_p1), %s780_s11, 256  }
 0x200   : > { %1361 = vsyncadd (%p1025_p1), %s780_s11, 4294967040  ;;  %s1752_s15 = sadd.s32 4294967294, %s1388_s10  }
 0x201   : > { %s789_s13 = sand.u32 1, %s1752_s15  }
 0x202   : > { %s790_s12 = scalar_lea.sflag [#allocation12], %s789_s13 }
 0x203   : > { %1363 = dma.done.wait (%p1025_p1), %s790_s12, 64  }
 0x204   : > { %1365 = vsyncadd (%p1025_p1), %s790_s12, 4294967232  ;;  %s30_s10 = sadd.s32 1, %s1388_s10   ;;  %s1753_s23 = sld [smem:[#allocation21_spill]] }
 0x205   : > { %p27_p3 = scmp.ge.s32.totalorder %s30_s10, 4   ;;  %s1754_s27 = smov %s1372_s28 }
 0x206   : > { %s1755_s28 = smov %s1376_s29  ;;  %s1756_s29 = smov %s1552_s22 }
 0x207   : > { %s1757_s30 = smov %s1384_s9  ;;  %29 = sbr.rel (!%p27_p3) target bundleno = 14 (0xe), region = 137 }
 0x20a   : > { %s1758_s9 = smov %s1753_s23 }
 0x20c   :  { %806 = vsyncpa [#allocation3], 1 }
 0x20d   :  { %808 = vsyncpa [#allocation3 + $0x1], 1 }
 0x20e   :  { %809 = vsyncpa [#allocation6], 1 }
 0x20f   :  { %810 = vsyncpa [#allocation9], 1 }
 0x210   :  { %811 = vsyncpa [#allocation4], 1 }
 0x211   :  { %813 = vsyncpa [#allocation4 + $0x1], 1 }
 0x212   :  { %814 = vsyncpa [#allocation12], 1 }
 0x213   :  { %816 = vsyncpa [#allocation12 + $0x1], 1 }

</bundles_post_ra>
